<compile_context>
chip_gen: v7x
topology: tpu7x:2x2x1
jax: 0.10.0
libtpu: 0.0.40
codegen_flags: <defaults>
</compile_context>

<pallas_src>
import jax
import jax.numpy as jnp
from jax import lax
from jax.experimental import pallas as pl
from jax.experimental.pallas import tpu as pltpu


# ----------------------------------------------------------------------------
# Tile planning helpers.
# ----------------------------------------------------------------------------
def _round_down(x, m):
    return (x // m) * m


def _round_up(x, m):
    return ((x + m - 1) // m) * m


def _vmem_budget():
    """(vmem_limit_bytes, per-tile budget) derived from the chip's VMEM."""
    cap = 64 << 20  # conservative default: v7x per-TensorCore VMEM
    try:
        info = pltpu.get_tpu_info()
        cap = int(getattr(info, "vmem_capacity_bytes", cap)) or cap
    except Exception:
        pass
    # 48 MiB scoped limit on v7x (64 MiB physical), 96 MiB on v5e/v6e (128 MiB).
    vmem_limit = min((cap * 3) // 4, 96 << 20)
    # The per-element cost model below already counts the f32 temporaries, so
    # leave ~25% headroom for Mosaic scratch / semaphores / misc.
    tile_budget = (vmem_limit * 3) // 4
    return vmem_limit, tile_budget


def _plan_tiles(rows, hw, itemsize, budget_bytes, target_steps=8):
    """Pick (tile_rows, tile_cols) for the (rows, hw) slab.

    Per-element VMEM bytes counted against the budget:
      * double-buffered input + output tiles : 2 * 2 * itemsize
      * in-kernel f32 temporaries (upcast x + ~1 compute temp) : ~2 * 4
    (The previous version ignored the f32 temps, which under-counted bf16 ~2x.)
    """
    bpe = 4 * itemsize + 8
    min_tr = rows if rows < 8 else 8

    if min_tr * hw * bpe <= budget_bytes:
        # Fast path: full-width (tr, hw) row tiles, single-pass kernel.
        if rows <= 8:
            return rows, hw
        tr = min(rows, max(8, _round_down(budget_bytes // (hw * bpe), 8)))
        # For non-trivial workloads keep >= target_steps grid steps so the
        # pipeline double-buffers and both v7x TCs get work; skip for tiny
        # arrays where per-step overhead would dominate.
        if rows * hw * itemsize > (2 << 20):
            tr = min(tr, max(8, _round_down(pl.cdiv(rows, target_steps), 8)))
        return tr, hw

    # Column-tiled path: even an 8-row full-width tile blows the budget.
    tr = min_tr
    tc = _round_down(budget_bytes // (tr * bpe), 128)
    tc = max(128, min(tc, _round_up(hw, 128)))
    if tc >= hw:            # degenerate (tiny hw): just use full-width tiles
        tc = hw
    return tr, tc


# ----------------------------------------------------------------------------
# Kernel A: single-pass instance norm + affine (full H*W per tile).
# Rows of the (B*C, H*W) slab are independent instances.
# ----------------------------------------------------------------------------
def adain_rows_kernel(x_ref, ss_ref, o_ref):
    # x_ref : (tr, hw) content dtype ; ss_ref : (tr, 2) f32 = [scale | shift].
    x = x_ref[...].astype(jnp.float32)          # the only full-tile f32 temp
    inv_n = 1.0 / x.shape[-1]
    s1 = jnp.sum(x, axis=-1, keepdims=True)
    s2 = jnp.sum(x * x, axis=-1, keepdims=True)
    mean = s1 * inv_n
    # Biased variance + eps=1e-5 matches F.instance_norm; clamp guards fp
    # cancellation in the one-pass formula.
    var = jnp.maximum(s2 * inv_n - mean * mean, 0.0)
    a = ss_ref[:, 0:1] * lax.rsqrt(var + 1e-5)                  # (tr, 1)
    b = ss_ref[:, 1:2] - mean * a                               # (tr, 1)
    o_ref[...] = (x * a + b).astype(o_ref.dtype)                # 1 mul + 1 add


# ----------------------------------------------------------------------------
# Kernel B: column-tiled two-phase instance norm + affine for large H*W.
# Grid = (row tiles, phase, col tiles). Phase 0 accumulates per-row sum /
# sum-of-squares into VMEM scratch; phase 1 folds the affine once per row tile
# (at k == 0) and writes the output column tiles.
# ----------------------------------------------------------------------------
def _make_adain_cols_kernel(hw):
    inv_n = 1.0 / float(hw)

    def kernel(x_ref, ss_ref, o_ref, sum_ref, sq_ref, a_ref, b_ref):
        phase = pl.program_id(1)
        k = pl.program_id(2)
        x = x_ref[...].astype(jnp.float32)                      # (tr, tc)

        @pl.when(phase == 0)
        def _():
            @pl.when(k == 0)
            def _():
                sum_ref[...] = jnp.zeros_like(sum_ref)
                sq_ref[...] = jnp.zeros_like(sq_ref)
            # Mask the padded columns of the (possibly partial) last tile so
            # garbage never enters the statistics.
            col = k * x.shape[1] + lax.broadcasted_iota(jnp.int32, x.shape, 1)
            xm = jnp.where(col < hw, x, 0.0)
            sum_ref[...] += jnp.sum(xm, axis=-1, keepdims=True)
            sq_ref[...] += jnp.sum(xm * xm, axis=-1, keepdims=True)

        @pl.when(phase == 1)
        def _():
            @pl.when(k == 0)
            def _():
                mean = sum_ref[...] * inv_n
                var = jnp.maximum(sq_ref[...] * inv_n - mean * mean, 0.0)
                a = ss_ref[:, 0:1] * lax.rsqrt(var + 1e-5)
                a_ref[...] = a
                b_ref[...] = ss_ref[:, 1:2] - mean * a
            o_ref[...] = (x * a_ref[...] + b_ref[...]).astype(o_ref.dtype)

    return kernel


# ----------------------------------------------------------------------------
# Wrapper: instance norm + per-instance affine.
# ----------------------------------------------------------------------------
def adain_apply(content, scale, shift, *, tile_budget_bytes=None):
    B, C, H, W = content.shape
    rows, hw = B * C, H * W
    x2d = content.reshape(rows, hw)                             # keep model dtype
    # Merge scale & shift into one lane-dense (rows, 2) f32 input.
    ss = jnp.stack(
        [scale.reshape(rows), shift.reshape(rows)], axis=-1
    ).astype(jnp.float32)

    vmem_limit, budget = _vmem_budget()
    if tile_budget_bytes is not None:
        budget = min(budget, tile_budget_bytes)
    tr, tc = _plan_tiles(rows, hw, jnp.dtype(content.dtype).itemsize, budget)

    if tc >= hw:
        # Fast path: one pass, full-width row tiles (partial last tile OK —
        # padded rows are computed and discarded by the clipped writeback).
        out2d = pl.pallas_call(
            adain_rows_kernel,
            out_shape=jax.ShapeDtypeStruct((rows, hw), content.dtype),
            grid=(pl.cdiv(rows, tr),),
            in_specs=[
                pl.BlockSpec((tr, hw), lambda i: (i, 0)),
                pl.BlockSpec((tr, 2), lambda i: (i, 0)),
            ],
            out_specs=pl.BlockSpec((tr, hw), lambda i: (i, 0)),
            compiler_params=pltpu.CompilerParams(
                dimension_semantics=("parallel",),
                vmem_limit_bytes=vmem_limit,
            ),
        )(x2d, ss)
    else:
        # Column-tiled two-phase path for large H*W. The output index map
        # parks the output block at (i, 0) during phase 0 (kernel never writes
        # it then), so no garbage is ever flushed and writes are not doubled.
        n_k = pl.cdiv(hw, tc)
        out2d = pl.pallas_call(
            _make_adain_cols_kernel(hw),
            out_shape=jax.ShapeDtypeStruct((rows, hw), content.dtype),
            grid=(pl.cdiv(rows, tr), 2, n_k),
            in_specs=[
                pl.BlockSpec((tr, tc), lambda i, p, k: (i, k)),
                pl.BlockSpec((tr, 2), lambda i, p, k: (i, 0)),
            ],
            out_specs=pl.BlockSpec((tr, tc), lambda i, p, k: (i, k * p)),
            scratch_shapes=[pltpu.VMEM((tr, 1), jnp.float32) for _ in range(4)],
            compiler_params=pltpu.CompilerParams(
                dimension_semantics=("parallel", "arbitrary", "arbitrary"),
                vmem_limit_bytes=vmem_limit,
            ),
        )(x2d, ss)

    return out2d.reshape(B, C, H, W)


# ----------------------------------------------------------------------------
# Full AdaIN forward. The two tiny style nn.Linear layers ((B,32)x(32,C)) are
# far below MXU granularity, so per the perf review they are a plain XLA dot
# in the wrapper (fuses with the reshape/stack glue); the HBM-bound instance
# norm + affine hot path is the Pallas kernel above.
# ----------------------------------------------------------------------------
def adain_forward(content, style, params, *, tile_budget_bytes=None):
    B = style.shape[0]
    style_flat = style.reshape(B, -1).astype(jnp.float32)       # style.view(B, -1)
    scale = style_flat @ params["w_scale"] + params["b_scale"]  # (B, C)
    shift = style_flat @ params["w_shift"] + params["b_shift"]  # (B, C)
    return adain_apply(content, scale, shift, tile_budget_bytes=tile_budget_bytes)


# Pure-JAX reference for correctness checking.
def adain_reference(content, style, params):
    B = style.shape[0]
    s = style.reshape(B, -1).astype(jnp.float32)
    scale = s @ params["w_scale"] + params["b_scale"]
    shift = s @ params["w_shift"] + params["b_shift"]
    x = content.astype(jnp.float32)
    mean = x.mean(axis=(2, 3), keepdims=True)
    var = x.var(axis=(2, 3), keepdims=True)
    xn = (x - mean) / jnp.sqrt(var + 1e-5)
    return (xn * scale[:, :, None, None] + shift[:, :, None, None]).astype(content.dtype)


if __name__ == "__main__":
    # Small deterministic shapes consistent with the module:
    #   style_dim = 8, content_dim (channels) = 4
    #   content: (B, C, H, W) = (2, 4, 16, 16)
    #   style:   (B, style_dim, 2, 2) = (2, 8, 2, 2)  -> flattened dim 32
    B, C, H, W = 2, 4, 16, 16
    style_dim = 8
    s4 = style_dim * 2 * 2

    key = jax.random.PRNGKey(0)
    kc, ks, kw1, kb1, kw2, kb2, kc2 = jax.random.split(key, 7)

    content = jax.random.normal(kc, (B, C, H, W), dtype=jnp.float32)
    style = jax.random.normal(ks, (B, style_dim, 2, 2), dtype=jnp.float32)

    # PyTorch Linear stores weight as (out, in); stored transposed (in, out)
    # here for row-major matmul; bias is (out,).
    bound = 1.0 / float(jnp.sqrt(s4))
    params = {
        "w_scale": jax.random.uniform(kw1, (s4, C), jnp.float32, -bound, bound),
        "b_scale": jax.random.uniform(kb1, (C,), jnp.float32, -bound, bound),
        "w_shift": jax.random.uniform(kw2, (s4, C), jnp.float32, -bound, bound),
        "b_shift": jax.random.uniform(kb2, (C,), jnp.float32, -bound, bound),
    }

    # 1) Fast path (full-width row tiles).
    out = jax.block_until_ready(adain_forward(content, style, params))
    ref = adain_reference(content, style, params)
    assert out.shape == (B, C, H, W)
    assert jnp.allclose(out, ref, atol=1e-4, rtol=1e-4), "row-path mismatch vs reference"

    # 2) Column-tiled (large H*W) path, exercised at a small shape by forcing
    #    a tiny per-tile budget; 20*20 = 400 cols -> tc=128/256 with a masked
    #    partial last column tile.
    content2 = jax.random.normal(kc2, (B, C, 20, 20), dtype=jnp.float32)
    out2 = jax.block_until_ready(
        adain_forward(content2, style, params, tile_budget_bytes=64 * 1024)
    )
    ref2 = adain_reference(content2, style, params)
    assert jnp.allclose(out2, ref2, atol=1e-4, rtol=1e-4), "col-path mismatch vs reference"

    print("KERNEL_OK")
</pallas_src>

<mosaic_0001>
module attributes {stable_mosaic.version = 11 : i64} {
  func.func @adain_rows_kernel(%arg0: i32, %arg1: memref<8x256xf32, #tpu.memory_space<vmem>>, %arg2: memref<8x2xf32, #tpu.memory_space<vmem>>, %arg3: memref<8x256xf32, #tpu.memory_space<vmem>>) attributes {dimension_semantics = [#tpu.dimension_semantics<parallel>], iteration_bounds = array<i64: 1>, scalar_prefetch = 0 : i64, scratch_operands = 0 : i64, tpu.core_type = #tpu.core_type<tc>, window_params = [{transform_indices = @transform_0, window_bounds = array<i64: 8, 256>}, {transform_indices = @transform_1, window_bounds = array<i64: 8, 2>}, {transform_indices = @transform_2, window_bounds = array<i64: 8, 256>}]} {
    %c0 = arith.constant 0 : index
    %c0_0 = arith.constant 0 : index
    %0 = vector.load %arg1[%c0, %c0_0] : memref<8x256xf32, #tpu.memory_space<vmem>>, vector<8x256xf32>
    %cst = arith.constant dense<0.000000e+00> : vector<8xf32>
    %1 = vector.multi_reduction <add>, %0, %cst [1] : vector<8x256xf32> to vector<8xf32>
    %2 = vector.shape_cast %1 : vector<8xf32> to vector<8x1xf32>
    %3 = arith.mulf %0, %0 : vector<8x256xf32>
    %cst_1 = arith.constant dense<0.000000e+00> : vector<8xf32>
    %4 = vector.multi_reduction <add>, %3, %cst_1 [1] : vector<8x256xf32> to vector<8xf32>
    %5 = vector.shape_cast %4 : vector<8xf32> to vector<8x1xf32>
    %cst_2 = arith.constant 3.906250e-03 : f32
    %6 = vector.broadcast %cst_2 : f32 to vector<8x1xf32>
    %7 = arith.mulf %2, %6 : vector<8x1xf32>
    %cst_3 = arith.constant 3.906250e-03 : f32
    %8 = vector.broadcast %cst_3 : f32 to vector<8x1xf32>
    %9 = arith.mulf %5, %8 : vector<8x1xf32>
    %10 = arith.mulf %7, %7 : vector<8x1xf32>
    %11 = arith.subf %9, %10 : vector<8x1xf32>
    %cst_4 = arith.constant 0.000000e+00 : f32
    %12 = vector.broadcast %cst_4 : f32 to vector<8x1xf32>
    %13 = arith.maximumf %11, %12 : vector<8x1xf32>
    %c0_5 = arith.constant 0 : index
    %c0_6 = arith.constant 0 : index
    %14 = vector.load %arg2[%c0_5, %c0_6] : memref<8x2xf32, #tpu.memory_space<vmem>>, vector<8x1xf32>
    %cst_7 = arith.constant 9.99999974E-6 : f32
    %15 = vector.broadcast %cst_7 : f32 to vector<8x1xf32>
    %16 = arith.addf %13, %15 : vector<8x1xf32>
    %17 = math.rsqrt %16 : vector<8x1xf32>
    %18 = arith.mulf %14, %17 : vector<8x1xf32>
    %c0_8 = arith.constant 0 : index
    %c1 = arith.constant 1 : index
    %19 = vector.load %arg2[%c0_8, %c1] : memref<8x2xf32, #tpu.memory_space<vmem>>, vector<8x1xf32>
    %20 = arith.mulf %7, %18 : vector<8x1xf32>
    %21 = arith.subf %19, %20 : vector<8x1xf32>
    %22 = vector.broadcast %18 : vector<8x1xf32> to vector<8x256xf32>
    %23 = arith.mulf %0, %22 : vector<8x256xf32>
    %24 = vector.broadcast %21 : vector<8x1xf32> to vector<8x256xf32>
    %25 = arith.addf %23, %24 : vector<8x256xf32>
    %c0_9 = arith.constant 0 : index
    %c0_10 = arith.constant 0 : index
    %26 = vector.load %arg3[%c0_9, %c0_10] : memref<8x256xf32, #tpu.memory_space<vmem>>, vector<8x256xf32>
    tpu.vector_store %arg3[%c0_9, %c0_10], %25 {strides = array<i32>} : memref<8x256xf32, #tpu.memory_space<vmem>>, vector<8x256xf32>,
    return
  }
  func.func @transform_0(%arg0: i32) -> (i32, i32) {
    %c0_i32 = arith.constant 0 : i32
    %c0_i32_0 = arith.constant 0 : i32
    return %arg0, %c0_i32 : i32, i32
  }
  func.func @transform_1(%arg0: i32) -> (i32, i32) {
    %c0_i32 = arith.constant 0 : i32
    %c0_i32_0 = arith.constant 0 : i32
    return %arg0, %c0_i32 : i32, i32
  }
  func.func @transform_2(%arg0: i32) -> (i32, i32) {
    %c0_i32 = arith.constant 0 : i32
    %c0_i32_0 = arith.constant 0 : i32
    return %arg0, %c0_i32 : i32, i32
  }
}

</mosaic_0001>

<bundles_post_ra>
// kernel: tpu_custom_call.1
= control target key start
LH: loop header
LB: loop body
LE: loop exit
PB: predicated region body
PF: predicated region fallthrough
CT: control target
= control target key end

     0   :  { %7 = vsyncpa [#allocation3], 0  ;;  %s184_s0 = inlined_call_operand.hbm [shape: f32[8,256], index: 0, kind: input, shape index: {}]   ;;  %s185_s1 = inlined_call_operand.vmem [shape: f32[8,2], index: 1, kind: input, shape index: {}]   ;;  %s186_s2 = inlined_call_operand.hbm [shape: f32[8,256], index: 2, kind: output, shape index: {}]  }
   0x1   :  { %8 = vsyncpa [#allocation4], 0  ;;  %s137_s9 = smov [#allocation2]   ;;  %s89_s13 = scalar_lea.hbm %s184_s0, 256 }
   0x2   :  { %s15_s10 = sshll.u32 %s137_s9, 4  ;;  %p90_p0 = scmp.ne.s32.totalorder %s184_s0, %s89_s13  ;;  %s16_s10 = int_to_ptr.vmem [resolvable:$true] %s15_s10 }
   0x3   :  { %p93_p1 = scmp.lt.u32.totalorder %s89_s13, %s184_s0 }
   0x5   :  { %p95_p2 = pnand %p93_p1, %p90_p0 }
   0x7   :  { %98 = shalt.err (!%p95_p2)
}
   0x8   :  { %s99_s18 = scalar_lea.vmem %s16_s10, 256  ;;  %p104_p4 = scmp.lt.s32.totalorder %s16_s10, %s16_s10 }
   0x9   :  { %p100_p3 = scmp.ne.s32.totalorder %s16_s10, %s99_s18  ;;  %p105_p5 = scmp.lt.s32.totalorder %s99_s18, %s99_s18 }
   0xb   :  { %p106_p6 = por %p105_p5, %p104_p4 }
   0xd   :  { %p107_p7 = pnand %p106_p6, %p100_p3 }
   0xf   :  { %110 = shalt.err (!%p107_p7)
}
  0x10   :  { %18 = dma.hbm_to_vmem [thread:$0]  %s184_s0, 256, %s16_s10, [#allocation3]  }
  0x11   :  { %133 = dma.done.wait [#allocation3], 256  }
  0x12   :  { %134 = vsyncadd [#allocation3], 4294967040  ;;  %v24_v0 = vld [vmem:[#allocation2] sm:$0xff]  ;;  %v25_v1 = vld [vmem:[#allocation2 + $0x8] sm:$0xff]  ;;  %v138_v6 = vmov 0   ;;  %v139_v15 = vmov 1  }
  0x13   :  { %v26_v2 = vadd.f32 %v25_v1, %v24_v0  ;;  %v29_v3 = vmul.f32 %v24_v0, %v24_v0  ;;  %v30_v4 = vmul.f32 %v25_v1, %v25_v1  ;;  %85 = vset.pattern.permute.xlu1 %v138_v6  ;;  %86 = vset.pattern.permute.xlu0 %v139_v15  ;;  %v39_v16 = vld [vmem:[%s185_s1] sm:$0xff]  ;;  %s140_s22 = smov 1   ;;  %s141_s23 = smov [#allocation5]  }
  0x14   :  { %s71_s24 = sshll.u32 %s141_s23, 4  ;;  %s72_s24 = int_to_ptr.vmem [resolvable:$true] %s71_s24 }
  0x15   :  { %27 = vadd.xlane.f32.xlu0 %v26_v2  ;;  %v31_v5 = vadd.f32 %v30_v4, %v29_v3  ;;  %s111_s1 = scalar_lea.vmem %s72_s24, 256  ;;  %p116_p9 = scmp.lt.s32.totalorder %s72_s24, %s72_s24 }
  0x16   :  { %p112_p8 = scmp.ne.s32.totalorder %s72_s24, %s111_s1  ;;  %p117_p10 = scmp.lt.s32.totalorder %s111_s1, %s111_s1 }
  0x18   :  { %p118_p11 = por %p117_p10, %p116_p9 }
  0x19   :  { %32 = vadd.xlane.f32.xlu0 %v31_v5 }
  0x1a   :  { %p119_p12 = pnand %p118_p11, %p112_p8 }
  0xa2   :  { %v28_v7 = vpop.xlane.xlu0 %27 }
  0xa3   :  { %v34_v8 = vmul.f32 0.00390625, %v28_v7 }
  0xa5   :  { %v36_v10 = vmul.f32 %v34_v8, %v34_v8 }
  0xa6   :  { %v33_v9 = vpop.xlane.xlu0 %32 }
  0xa7   :  { %v35_v11 = vmul.f32 0.00390625, %v33_v9 }
  0xa9   :  { %v37_v12 = vsub.f32 %v35_v11, %v36_v10 }
  0xab   :  { %v38_v13 = vmax.f32 %v37_v12, 0.0 }
  0xad   :  { %v40_v14 = vadd.f32 1e-05, %v38_v13 }
  0xaf   :  { %87 = vrsqrt.f32 %v40_v14 }
  0xb9   :  { %v88_v17 = vpop.eup %87 }
  0xba   :  { %v42_v18 = vmul.f32 %v88_v17, %v39_v16 }
  0xbc   :  { %v43_v19 = vmul.f32 %v42_v18, %v34_v8 }
  0xbe   :  { %45 = vrot.lane.b32.xlu1 %v43_v19, %s140_s22 }
  0xc2   :  { %51 = vperm.xlu1 %85, %v42_v18  }
 0x130   :  { %v46_v20 = vpop.permute.xlu1 %45 }
 0x131   :  { %v48_v21 = vsub.f32 %v39_v16, %v46_v20 }
 0x133   :  { %58 = vperm.xlu0 %86, %v48_v21  }
 0x141   :  { %v52_v22 = vpop.permute.xlu1 %51 }
 0x142   :  { %v54_v23 = vmul.f32 %v52_v22, %v24_v0  ;;  %v55_v24 = vmul.f32 %v52_v22, %v25_v1 }
 0x1b2   :  { %v59_v25 = vpop.permute.xlu0 %58 }
 0x1b3   :  { %v61_v26 = vadd.f32 %v59_v25, %v54_v23  ;;  %v62_v27 = vadd.f32 %v59_v25, %v55_v24 }
 0x1b5   :  { %63 = vst [vmem:[#allocation5] sm:$0xff] %v61_v26  ;;  %64 = vst [vmem:[#allocation5 + $0x8] sm:$0xff] %v62_v27 }
 0x1b6   :  { %122 = shalt.err (!%p119_p12)
}
 0x1b7   :  { %s123_s27 = scalar_lea.hbm %s186_s2, 256 }
 0x1b8   :  { %p124_p13 = scmp.ne.s32.totalorder %s186_s2, %s123_s27  ;;  %p127_p0 = scmp.lt.u32.totalorder %s123_s27, %s186_s2 }
 0x1ba   :  { %p129_p1 = pnand %p127_p0, %p124_p13 }
 0x1bc   :  { %132 = shalt.err (!%p129_p1)
}
 0x1bd   :  { %74 = dma.vmem_to_hbm [thread:$0]  %s72_s24, 256, %s186_s2, [#allocation4]  }
 0x1be   :  { %135 = dma.done.wait [#allocation4], 256  }
 0x1bf   :  { %136 = vsyncadd [#allocation4], 4294967040 }
 0x1c0   :  { %78 = vsyncpa [#allocation3], 1 }
 0x1c1   :  { %79 = vsyncpa [#allocation4], 1 }

</bundles_post_ra>
